<compile_context>
chip_gen: v5e
topology: v5e:2x2
jax: 0.10.0
libtpu: 0.0.40
codegen_flags: <defaults>
</compile_context>

<pallas_src>
import jax
import jax.numpy as jnp
from jax.experimental import pallas as pl
from jax.experimental.pallas import tpu as pltpu


def _round_up(a, b):
    return (a + b - 1) // b * b


def _choose_h_tile(H, max_th=512):
    """Lane-dense (multiple of 128) hidden tile that divides the padded H."""
    Hp = _round_up(H, 128)
    th = 128
    for cand in range(_round_up(min(max_th, Hp), 128), 127, -128):
        if Hp % cand == 0:
            th = cand
            break
    return Hp, th


def _choose_m_tile(N, max_tm=512):
    """Row tile: multiple of 8, covers N with minimal padding."""
    Np = _round_up(N, 8)
    n_blocks = -(-Np // max_tm)
    tm = _round_up(-(-Np // n_blocks), 8)
    return n_blocks * tm, tm


def residual_linear_kernel(x_ref, w_ref, b_ref, o_ref, acc_ref):
    """One (i, j, k) grid step of  out = x + x @ W^T + b.

    x_ref  : (tm, th) LHS tile of x for K slice k (doubles as the residual tile when k == j)
    w_ref  : (th, th) weight tile (W^T layout)
    b_ref  : (1,  th) bias tile
    o_ref  : (tm, th) output tile (resident across the K axis)
    acc_ref: (tm, th) f32 accumulator scratch (resident across the K axis)
    """
    j = pl.program_id(1)
    k = pl.program_id(2)

    @pl.when(k == 0)
    def _init():
        # Fold the bias into the accumulator init: saves a (tm, th) VALU add
        # and an extra accumulator read in the epilogue.
        acc_ref[...] = jnp.broadcast_to(
            b_ref[...].astype(jnp.float32), acc_ref.shape)

    @pl.when(k == j)
    def _residual():
        # tk == tn == th, so the LHS tile at k == j is exactly the
        # output-column block of x -> no second HBM stream for the residual.
        acc_ref[...] += x_ref[...].astype(jnp.float32)

    # MXU matmul, f32 accumulation.
    acc_ref[...] += jnp.dot(x_ref[...], w_ref[...],
                            preferred_element_type=jnp.float32)

    # Epilogue: single store of the finished tile.
    @pl.when(k == pl.num_programs(2) - 1)
    def _finalize():
        o_ref[...] = acc_ref[...].astype(o_ref.dtype)


def prepare_residual_linear_params(w, b, *, max_th=512):
    """Once-per-weight prep (hoisted out of the forward path): transpose the
    torch-layout [out, in] weight and zero-pad W^T / bias to Hp."""
    H_out, H_in = w.shape
    assert H_out == H_in, "Residual(Linear) requires a square weight"
    assert b.shape == (H_in,)
    Hp, _ = _choose_h_tile(H_in, max_th)
    w_t_p = jnp.pad(w.T, ((0, Hp - H_in), (0, Hp - H_in)))
    b_p = jnp.pad(b, (0, Hp - H_in)).reshape(1, Hp)
    return w_t_p, b_p


def residual_forward(x, w_t_p, b_p, *, max_tm=512, max_th=512,
                     cast_mxu_bf16=False):
    """y = x + x @ W^T + b, with params from prepare_residual_linear_params."""
    N, H = x.shape
    Hp, th = _choose_h_tile(H, max_th)
    assert w_t_p.shape == (Hp, Hp) and b_p.shape == (1, Hp)
    Mp, tm = _choose_m_tile(N, max_tm)

    xp = jnp.pad(x, ((0, Mp - N), (0, Hp - H)))
    wp = w_t_p
    if cast_mxu_bf16:
        # Optional throughput lever on v6e/v7x (bf16 MXU peak, half the HBM
        # bytes). The residual is then added from the bf16-rounded x tile, so
        # only enable when numerics permit.
        xp = xp.astype(jnp.bfloat16)
        wp = wp.astype(jnp.bfloat16)

    grid = (Mp // tm, Hp // th, Hp // th)  # (rows, out-cols, K) -- reduction last

    in_itemsize = jnp.dtype(xp.dtype).itemsize
    out_itemsize = jnp.dtype(x.dtype).itemsize
    cost = pl.CostEstimate(
        flops=2 * Mp * Hp * Hp,
        transcendentals=0,
        bytes_accessed=(Mp * Hp + Hp * Hp + Hp) * in_itemsize
        + Mp * Hp * out_itemsize,
    )

    # Double-buffered x / W / bias tiles + double-buffered output + f32 acc.
    vmem_est = (2 * (tm * th + th * th + th) * in_itemsize
                + 2 * tm * th * out_itemsize
                + tm * th * 4)
    vmem_limit = min(max(2 * vmem_est, 32 * 1024 * 1024), 64 * 1024 * 1024)

    out = pl.pallas_call(
        residual_linear_kernel,
        out_shape=jax.ShapeDtypeStruct((Mp, Hp), x.dtype),
        grid=grid,
        in_specs=[
            pl.BlockSpec((tm, th), lambda i, j, k: (i, k)),  # x (LHS; residual at k==j)
            pl.BlockSpec((th, th), lambda i, j, k: (k, j)),  # W^T tile
            pl.BlockSpec((1, th), lambda i, j, k: (0, j)),   # bias tile
        ],
        out_specs=pl.BlockSpec((tm, th), lambda i, j, k: (i, j)),
        scratch_shapes=[pltpu.VMEM((tm, th), jnp.float32)],
        compiler_params=pltpu.CompilerParams(
            dimension_semantics=("parallel", "parallel", "arbitrary"),
            vmem_limit_bytes=vmem_limit,
        ),
        cost_estimate=cost,
    )(xp, wp, b_p)

    return out[:N, :H]


def reference_forward(x, w, b):
    # Pure-JAX reference of Residual(Linear): x + x @ W^T + b
    return x + x @ w.T + b.reshape(1, -1)


if __name__ == "__main__":
    key = jax.random.PRNGKey(0)
    batch, seq, hidden = 2, 8, 32

    kx, kw, kb = jax.random.split(key, 3)
    x = jax.random.normal(kx, (batch, seq, hidden), dtype=jnp.float32)
    # Deterministic synthetic Linear params (shapes from nn.Linear(hidden, hidden)).
    w = jax.random.normal(kw, (hidden, hidden), dtype=jnp.float32) * 0.05  # torch weight [out, in]
    b = jax.random.normal(kb, (hidden,), dtype=jnp.float32) * 0.05

    # Hoisted once-per-weight prep (transpose + pad); only x is padded per call.
    w_t_p, b_p = prepare_residual_linear_params(w, b)

    x2d = x.reshape(batch * seq, hidden)   # flatten tokens; glue in plain JAX
    out = residual_forward(x2d, w_t_p, b_p)
    out = jax.block_until_ready(out)

    ref = reference_forward(x2d, w, b)
    assert out.shape == (batch * seq, hidden)
    assert jnp.allclose(out, ref, atol=1e-5, rtol=1e-5), "mismatch vs reference"

    out = out.reshape(batch, seq, hidden)  # restore original layout
    print("KERNEL_OK")
</pallas_src>

<mosaic_0001>
module attributes {stable_mosaic.version = 11 : i64} {
  func.func @residual_linear_kernel(%arg0: i32, %arg1: i32, %arg2: i32, %arg3: memref<16x128xf32, #tpu.memory_space<vmem>>, %arg4: memref<128x128xf32, #tpu.memory_space<vmem>>, %arg5: memref<1x128xf32, #tpu.memory_space<vmem>>, %arg6: memref<16x128xf32, #tpu.memory_space<vmem>>, %arg7: memref<16x128xf32, #tpu.memory_space<vmem>>) attributes {dimension_semantics = [#tpu.dimension_semantics<parallel>, #tpu.dimension_semantics<parallel>, #tpu.dimension_semantics<arbitrary>], iteration_bounds = array<i64: 1, 1, 1>, scalar_prefetch = 0 : i64, scratch_operands = 1 : i64, tpu.core_type = #tpu.core_type<tc>, window_params = [{transform_indices = @transform_0, window_bounds = array<i64: 16, 128>}, {transform_indices = @transform_1, window_bounds = array<i64: 128, 128>}, {transform_indices = @transform_2, window_bounds = array<i64: 1, 128>}, {transform_indices = @transform_3, window_bounds = array<i64: 16, 128>}]} {
    %c0_i32 = arith.constant 0 : i32
    %0 = arith.cmpi eq, %arg2, %c0_i32 : i32
    %1 = arith.extui %0 : i1 to i32
    %c0_i32_0 = arith.constant 0 : i32
    %2 = arith.cmpi ne, %1, %c0_i32_0 : i32
    scf.if %2 {
      %c0_11 = arith.constant 0 : index
      %c0_12 = arith.constant 0 : index
      %15 = vector.load %arg5[%c0_11, %c0_12] : memref<1x128xf32, #tpu.memory_space<vmem>>, vector<1x128xf32>
      %16 = vector.shape_cast %15 : vector<1x128xf32> to vector<1x128xf32>
      %17 = vector.broadcast %16 : vector<1x128xf32> to vector<16x128xf32>
      %c0_13 = arith.constant 0 : index
      %c0_14 = arith.constant 0 : index
      %18 = vector.load %arg7[%c0_13, %c0_14] : memref<16x128xf32, #tpu.memory_space<vmem>>, vector<16x128xf32>
      tpu.vector_store %arg7[%c0_13, %c0_14], %17 {strides = array<i32>} : memref<16x128xf32, #tpu.memory_space<vmem>>, vector<16x128xf32>,
    } else {
    }
    %3 = arith.cmpi eq, %arg2, %arg1 : i32
    %4 = arith.extui %3 : i1 to i32
    %c0_i32_1 = arith.constant 0 : i32
    %5 = arith.cmpi ne, %4, %c0_i32_1 : i32
    scf.if %5 {
      %c0_11 = arith.constant 0 : index
      %c0_12 = arith.constant 0 : index
      %15 = vector.load %arg7[%c0_11, %c0_12] : memref<16x128xf32, #tpu.memory_space<vmem>>, vector<16x128xf32>
      %c0_13 = arith.constant 0 : index
      %c0_14 = arith.constant 0 : index
      %16 = vector.load %arg3[%c0_13, %c0_14] : memref<16x128xf32, #tpu.memory_space<vmem>>, vector<16x128xf32>
      %17 = arith.addf %15, %16 : vector<16x128xf32>
      %c0_15 = arith.constant 0 : index
      %c0_16 = arith.constant 0 : index
      %18 = vector.load %arg7[%c0_15, %c0_16] : memref<16x128xf32, #tpu.memory_space<vmem>>, vector<16x128xf32>
      tpu.vector_store %arg7[%c0_15, %c0_16], %17 {strides = array<i32>} : memref<16x128xf32, #tpu.memory_space<vmem>>, vector<16x128xf32>,
    } else {
    }
    %c0 = arith.constant 0 : index
    %c0_2 = arith.constant 0 : index
    %6 = vector.load %arg7[%c0, %c0_2] : memref<16x128xf32, #tpu.memory_space<vmem>>, vector<16x128xf32>
    %c0_3 = arith.constant 0 : index
    %c0_4 = arith.constant 0 : index
    %7 = vector.load %arg3[%c0_3, %c0_4] : memref<16x128xf32, #tpu.memory_space<vmem>>, vector<16x128xf32>
    %c0_5 = arith.constant 0 : index
    %c0_6 = arith.constant 0 : index
    %8 = vector.load %arg4[%c0_5, %c0_6] : memref<128x128xf32, #tpu.memory_space<vmem>>, vector<128x128xf32>
    %cst = arith.constant dense<0.000000e+00> : vector<16x128xf32>
    %9 = tpu.matmul %7, %8, %cst {dimension_numbers = #tpu.dot_dimension_numbers<[1], [0], [0], [1], [0, 0, 1, 1], [], []>} : vector<16x128xf32>, vector<128x128xf32>, vector<16x128xf32> -> vector<16x128xf32>
    %10 = arith.addf %6, %9 : vector<16x128xf32>
    %c0_7 = arith.constant 0 : index
    %c0_8 = arith.constant 0 : index
    %11 = vector.load %arg7[%c0_7, %c0_8] : memref<16x128xf32, #tpu.memory_space<vmem>>, vector<16x128xf32>
    tpu.vector_store %arg7[%c0_7, %c0_8], %10 {strides = array<i32>} : memref<16x128xf32, #tpu.memory_space<vmem>>, vector<16x128xf32>,
    %c0_i32_9 = arith.constant 0 : i32
    %12 = arith.cmpi eq, %arg2, %c0_i32_9 : i32
    %13 = arith.extui %12 : i1 to i32
    %c0_i32_10 = arith.constant 0 : i32
    %14 = arith.cmpi ne, %13, %c0_i32_10 : i32
    scf.if %14 {
      %c0_11 = arith.constant 0 : index
      %c0_12 = arith.constant 0 : index
      %15 = vector.load %arg7[%c0_11, %c0_12] : memref<16x128xf32, #tpu.memory_space<vmem>>, vector<16x128xf32>
      %c0_13 = arith.constant 0 : index
      %c0_14 = arith.constant 0 : index
      %16 = vector.load %arg6[%c0_13, %c0_14] : memref<16x128xf32, #tpu.memory_space<vmem>>, vector<16x128xf32>
      tpu.vector_store %arg6[%c0_13, %c0_14], %15 {strides = array<i32>} : memref<16x128xf32, #tpu.memory_space<vmem>>, vector<16x128xf32>,
    } else {
    }
    return
  }
  func.func @transform_0(%arg0: i32, %arg1: i32, %arg2: i32) -> (i32, i32) {
    %c0_i32 = arith.constant 0 : i32
    return %arg0, %arg2 : i32, i32
  }
  func.func @transform_1(%arg0: i32, %arg1: i32, %arg2: i32) -> (i32, i32) {
    %c0_i32 = arith.constant 0 : i32
    return %arg2, %arg1 : i32, i32
  }
  func.func @transform_2(%arg0: i32, %arg1: i32, %arg2: i32) -> (i32, i32) {
    %c0_i32 = arith.constant 0 : i32
    %c0_i32_0 = arith.constant 0 : i32
    return %c0_i32, %arg1 : i32, i32
  }
  func.func @transform_3(%arg0: i32, %arg1: i32, %arg2: i32) -> (i32, i32) {
    %c0_i32 = arith.constant 0 : i32
    return %arg0, %arg1 : i32, i32
  }
}

</mosaic_0001>

<bundles_post_ra>
// kernel: tpu_custom_call.1
= control target key start
LH: loop header
LB: loop body
LE: loop exit
PB: predicated region body
PF: predicated region fallthrough
CT: control target
= control target key end

     0   :  { %8 = vsyncpa [#allocation4], 0  ;;  %s289_s0 = inlined_call_operand.hbm [shape: f32[16,128], index: 0, kind: input, shape index: {}]   ;;  %s290_s1 = inlined_call_operand.hbm [shape: f32[128,128], index: 1, kind: input, shape index: {}]   ;;  %s291_s2 = inlined_call_operand.vmem [shape: f32[1,128], index: 2, kind: input, shape index: {}]   ;;  %s292_s3 = inlined_call_operand.hbm [shape: f32[16,128], index: 3, kind: output, shape index: {}]  }
   0x1   :  { %9 = vsyncpa [#allocation7], 0 }
   0x2   :  { %10 = vsyncpa [#allocation5], 0  ;;  %s15_s14 = sshll.u32 %s289_s0, 4  ;;  %s243_s15 = smov [#allocation3]   ;;  %s16_s14 = int_to_ptr.hbm [resolvable:$true] %s15_s14 }
   0x3   :  { %s17_s16 = sshll.u32 %s243_s15, 4  ;;  %s28_s19 = sshll.u32 %s290_s1, 4  ;;  %s18_s16 = int_to_ptr.vmem [resolvable:$true] %s17_s16  ;;  %s29_s19 = int_to_ptr.hbm [resolvable:$true] %s28_s19 }
   0x4   :  { %s244_s20 = smov 128   ;;  %s245_s21 = smov 8  }
   0x5   :  { %23 = dma.hbm_to_vmem [thread:$0]  %s16_s14, 256, %s18_s16, [#allocation4], %s244_s20, %s244_s20, %s245_s21  }
   0x6   :  { %s246_s22 = smov [#allocation6]  }
   0x7   :  { %s30_s23 = sshll.u32 %s246_s22, 4  ;;  %s31_s23 = int_to_ptr.vmem [resolvable:$true] %s30_s23 }
   0x8   :  { %36 = dma.hbm_to_vmem [thread:$0]  %s29_s19, 2048, %s31_s23, [#allocation7], %s244_s20, %s244_s20, %s245_s21  }
   0x9   :  { %237 = dma.done.wait [#allocation4], 256  }
   0xa   :  { %238 = vsyncadd [#allocation4], 4294967040 }
   0xb   :  { %239 = dma.done.wait [#allocation7], 2048  }
   0xc   :  { %240 = vsyncadd [#allocation7], 4294965248  ;;  %v88_v0 = vld [vmem:[#allocation6 + $0x78] sm:$0xff]  ;;  %v87_v1 = vld [vmem:[#allocation6 + $0x70] sm:$0xff]  ;;  %s247_s24 = smov [#allocation8]   ;;  %s129_s28 = sshll.u32 %s292_s3, 4  ;;  %s130_s28 = int_to_ptr.hbm [resolvable:$true] %s129_s28 }
   0xd   :  { %89 = vmatpush.msra.mxu0 %v88_v0  ;;  %143 = vmatpush.msra.mxu1 %v88_v0  ;;  %v86_v2 = vld [vmem:[#allocation6 + $0x68] sm:$0xff]  ;;  %v85_v3 = vld [vmem:[#allocation6 + $0x60] sm:$0xff]  ;;  %v84_v4 = vld [vmem:[#allocation6 + $0x58] sm:$0xff]  ;;  %s127_s25 = sshll.u32 %s247_s24, 4  ;;  %s128_s25 = int_to_ptr.vmem [resolvable:$true] %s127_s25 }
   0xe   :  { %v83_v5 = vld [vmem:[#allocation6 + $0x50] sm:$0xff]  ;;  %v82_v6 = vld [vmem:[#allocation6 + $0x48] sm:$0xff]  ;;  %v81_v7 = vld [vmem:[#allocation6 + $0x40] sm:$0xff] }
   0xf   :  { %90 = vmatpush.msra.mxu0 %v87_v1  ;;  %144 = vmatpush.msra.mxu1 %v87_v1  ;;  %v80_v8 = vld [vmem:[#allocation6 + $0x38] sm:$0xff]  ;;  %v79_v9 = vld [vmem:[#allocation6 + $0x30] sm:$0xff]  ;;  %v78_v10 = vld [vmem:[#allocation6 + $0x28] sm:$0xff] }
  0x10   :  { %v77_v11 = vld [vmem:[#allocation6 + $0x20] sm:$0xff]  ;;  %v76_v12 = vld [vmem:[#allocation6 + $0x18] sm:$0xff]  ;;  %v75_v13 = vld [vmem:[#allocation6 + $0x10] sm:$0xff] }
  0x11   :  { %91 = vmatpush.msra.mxu0 %v86_v2  ;;  %145 = vmatpush.msra.mxu1 %v86_v2  ;;  %v74_v14 = vld [vmem:[#allocation6 + $0x8] sm:$0xff]  ;;  %v73_v15 = vld [vmem:[#allocation6] sm:$0xff]  ;;  %v71_v16 = vld [vmem:[#allocation3] sm:$0xff] }
  0x12   :  { %v72_v17 = vld [vmem:[#allocation3 + $0x8] sm:$0xff]  ;;  %v164_v18 = vld [vmem:[%s291_s2] ss:$0 sm:$0xff] }
  0x13   :  { %92 = vmatpush.msra.mxu0 %v85_v3  ;;  %146 = vmatpush.msra.mxu1 %v85_v3  ;;  %v65_v19 = vadd.f32 %v164_v18, %v71_v16  ;;  %v66_v20 = vadd.f32 %v164_v18, %v72_v17 }
  0x15   :  { %93 = vmatpush.msra.mxu0 %v84_v4  ;;  %147 = vmatpush.msra.mxu1 %v84_v4 }
  0x17   :  { %94 = vmatpush.msra.mxu0 %v83_v5  ;;  %148 = vmatpush.msra.mxu1 %v83_v5 }
  0x19   :  { %95 = vmatpush.msra.mxu0 %v82_v6  ;;  %149 = vmatpush.msra.mxu1 %v82_v6 }
  0x1b   :  { %96 = vmatpush.msra.mxu0 %v81_v7  ;;  %150 = vmatpush.msra.mxu1 %v81_v7 }
  0x1d   :  { %97 = vmatpush.msra.mxu0 %v80_v8  ;;  %151 = vmatpush.msra.mxu1 %v80_v8 }
  0x1f   :  { %98 = vmatpush.msra.mxu0 %v79_v9  ;;  %152 = vmatpush.msra.mxu1 %v79_v9 }
  0x21   :  { %99 = vmatpush.msra.mxu0 %v78_v10  ;;  %153 = vmatpush.msra.mxu1 %v78_v10 }
  0x23   :  { %100 = vmatpush.msra.mxu0 %v77_v11  ;;  %154 = vmatpush.msra.mxu1 %v77_v11 }
  0x25   :  { %101 = vmatpush.msra.mxu0 %v76_v12  ;;  %155 = vmatpush.msra.mxu1 %v76_v12 }
  0x27   :  { %102 = vmatpush.msra.mxu0 %v75_v13  ;;  %156 = vmatpush.msra.mxu1 %v75_v13 }
  0x29   :  { %103 = vmatpush.msra.mxu0 %v74_v14  ;;  %157 = vmatpush.msra.mxu1 %v74_v14 }
  0x2b   :  { %104 = vmatpush.msra.mxu0 %v73_v15  ;;  %158 = vmatpush.msra.mxu1 %v73_v15 }
  0x2c   :  { %105 = vmatmul.f32.vlgmr.msra.gmra.mxu0 %v71_v16  ;;  %108 = vmatmul.f32.vlgmr.msra.gmra.mxu1 %v72_v17 }
  0xa9   :  { %v106_v21 = vpop.f32.mrf.mxu0  ;;  %v109_v22 = vpop.f32.mrf.mxu1 }
  0xaa   :  { %v112_v23 = vadd.f32 %v106_v21, %v65_v19  ;;  %v113_v24 = vadd.f32 %v109_v22, %v66_v20 }
  0xac   :  { %121 = vst [vmem:[#allocation8] sm:$0xff] %v112_v23 }
  0xad   :  { %122 = vst [vmem:[#allocation8 + $0x8] sm:$0xff] %v113_v24 }
  0xae   :  { %135 = dma.vmem_to_hbm [thread:$0]  %s128_s25, 256, %s130_s28, [#allocation5], %s244_s20, %s244_s20, %s245_s21  }
  0xaf   :  { %241 = dma.done.wait [#allocation5], 256  }
  0xb0   :  { %242 = vsyncadd [#allocation5], 4294967040 }
  0xb1   :  { %140 = vsyncpa [#allocation4], 1 }
  0xb2   :  { %141 = vsyncpa [#allocation7], 1 }
  0xb3   :  { %142 = vsyncpa [#allocation5], 1 }

</bundles_post_ra>
